<compile_context>
chip_gen: v7x
topology: tpu7x:2x2x1
jax: 0.10.0
libtpu: 0.0.40
codegen_flags: <defaults>
</compile_context>

<pallas_src>
import jax
import jax.numpy as jnp
from jax.experimental import pallas as pl
from jax.experimental.pallas import tpu as pltpu


def _attn_pool_kernel(x_ref, pos0_ref, poss_ref, wq2_ref, wkv_ref, wc2_ref,
                      bq2_ref, bkv_ref, bc_ref, mq_ref, mv_ref, o_ref):
    """One grid step processes TB batch elements.

    x_ref    : (TB, HW, C)  bf16 spatial tokens, channels-last
    pos0_ref : (1, C)   f32  positional embedding of the mean token
    poss_ref : (HW, C)  bf16 positional embedding of spatial tokens
    wq2_ref  : (C, 2C)  bf16 q weight (pre-scaled, zero-padded on the v half)
    wkv_ref  : (C, 2C)  bf16 fused [k | v] projection weight
    wc2_ref  : (2C, D)  bf16 output projection (zero rows on the k half)
    bq2/bkv  : (1, 2C)  f32  ;  bc_ref : (1, D) f32
    mq_ref   : (nh, 2C) bf16 per-head lane mask over the k half
    mv_ref   : (nh, 2C) f32  per-head lane mask over the v half
    o_ref    : (TB, D)  f32
    """
    f32 = jnp.float32
    xt = x_ref[...]                                      # (TB, HW, C) bf16
    tb, hw, c = xt.shape
    cdt = xt.dtype

    # Mean token (f32 accumulation) + its positional embedding.
    t0 = jnp.sum(xt.astype(f32), axis=1) * (1.0 / hw) + pos0_ref[...]          # (TB, C) f32
    t0c = t0.astype(cdt)

    # Spatial tokens + pos emb, flattened to an MXU-shaped 2-D matrix.
    ts2d = (xt + poss_ref[...][None]).reshape(tb * hw, c)                      # (TB*HW, C)

    # Fused K/V projection: one GEMM for all spatial tokens, one tiny one for the means.
    kv_s = (jnp.dot(ts2d, wkv_ref[...], preferred_element_type=f32)
            + bkv_ref[...]).astype(cdt).reshape(tb, hw, 2 * c)                 # (TB, HW, 2C)
    kv0 = jnp.dot(t0c, wkv_ref[...], preferred_element_type=f32) + bkv_ref[...]  # (TB, 2C) f32

    # Query projection of the mean tokens (head_dim**-0.5 folded into wq2/bq2).
    q2 = (jnp.dot(t0c, wq2_ref[...], preferred_element_type=f32)
          + bq2_ref[...]).astype(cdt)                                          # (TB, 2C)
    qm = q2[:, None, :] * mq_ref[...][None]                                    # (TB, nh, 2C)

    # All head scores in one batched MXU op (v lanes of qm are zero -> exact per-head dot).
    ss = jnp.einsum('bhc,blc->bhl', qm, kv_s, preferred_element_type=f32)      # (TB, nh, HW)
    s0 = jnp.sum(qm.astype(f32) * kv0[:, None, :], axis=-1, keepdims=True)     # (TB, nh, 1)

    # Numerically stable softmax over {mean token, spatial tokens}.
    m = jnp.maximum(jnp.max(ss, axis=-1, keepdims=True), s0)
    es = jnp.exp(ss - m)
    e0 = jnp.exp(s0 - m)
    inv = pl.reciprocal(e0 + jnp.sum(es, axis=-1, keepdims=True), approx=True)

    # Weighted sum of values for all heads in one batched MXU op.
    pv = jnp.einsum('bhl,blc->bhc', es.astype(cdt), kv_s,
                    preferred_element_type=f32)                                # (TB, nh, 2C)
    o2 = (pv + e0 * kv0[:, None, :]) * inv

    # Keep each head's own output channels (v half) and merge heads.
    attn = jnp.sum(o2 * mv_ref[...][None], axis=1)                             # (TB, 2C)

    y = jnp.dot(attn.astype(cdt), wc2_ref[...], preferred_element_type=f32) + bc_ref[...]
    o_ref[...] = y.astype(o_ref.dtype)


def attention_pool2d(x_nchw, params, num_heads, *, batch_block=None):
    """Pallas forward matching AttentionPool2d.forward. x_nchw: (N, C, H, W) -> (N, Dout)."""
    N, C, H, W = x_nchw.shape
    HW = H * W
    Dout = params["wc"].shape[0]
    hd = C // num_heads
    scale = hd ** -0.5
    f32, bf16 = jnp.float32, jnp.bfloat16

    # ---- parameter prep (one-time constants in real use) ----
    pos = params["pos"].astype(f32)
    pos0 = pos[:1]                                                      # (1, C) f32
    poss = pos[1:].astype(bf16)                                         # (HW, C)

    wq2 = jnp.concatenate([params["wq"].T * scale,
                           jnp.zeros((C, C), f32)], axis=1).astype(bf16)        # (C, 2C)
    bq2 = jnp.concatenate([params["bq"] * scale,
                           jnp.zeros((C,), f32)])[None].astype(f32)             # (1, 2C)
    wkv = jnp.concatenate([params["wk"].T, params["wv"].T], axis=1).astype(bf16)  # (C, 2C)
    bkv = jnp.concatenate([params["bk"], params["bv"]])[None].astype(f32)         # (1, 2C)
    wc2 = jnp.concatenate([jnp.zeros((C, Dout), f32),
                           params["wc"].T], axis=0).astype(bf16)                  # (2C, Dout)
    bc = params["bc"][None].astype(f32)                                           # (1, Dout)

    # Per-head lane masks, built once (nh, 2C): mq selects head-h lanes of the k half,
    # mv selects head-h lanes of the v half.
    col = jnp.arange(2 * C)[None, :]
    hid = jnp.arange(num_heads)[:, None]
    mq = (((col // hd) == hid) & (col < C)).astype(bf16)
    mv = ((((col - C) // hd) == hid) & (col >= C)).astype(f32)

    # Tokens channels-last.
    # TODO(synk): at production sizes this NCHW->NHWC transpose could be folded into the
    # kernel as a transposed-LHS projection to avoid one extra HBM round trip.
    x_tok = jnp.transpose(x_nchw.reshape(N, C, HW), (0, 2, 1)).astype(bf16)   # (N, HW, C)

    # Batch block: either the whole (small) batch, or a multiple of 8 for ragged grids.
    tb = batch_block or (N if N <= 32 else 32)
    grid = (pl.cdiv(N, tb),)

    def fixed(shape):
        nd = len(shape)
        return pl.BlockSpec(shape, lambda b, _nd=nd: (0,) * _nd)

    out = pl.pallas_call(
        _attn_pool_kernel,
        out_shape=jax.ShapeDtypeStruct((N, Dout), jnp.float32),
        grid=grid,
        in_specs=[
            pl.BlockSpec((tb, HW, C), lambda b: (b, 0, 0)),   # x tokens (one batch block / step)
            fixed((1, C)),              # pos0
            fixed((HW, C)),             # pos spatial
            fixed((C, 2 * C)),          # wq2
            fixed((C, 2 * C)),          # wkv (fused k|v)
            fixed((2 * C, Dout)),       # wc2 (zero-padded k half)
            fixed((1, 2 * C)),          # bq2
            fixed((1, 2 * C)),          # bkv
            fixed((1, Dout)),           # bc
            fixed((num_heads, 2 * C)),  # mq
            fixed((num_heads, 2 * C)),  # mv
        ],
        out_specs=pl.BlockSpec((tb, Dout), lambda b: (b, 0)),
        compiler_params=pltpu.CompilerParams(
            dimension_semantics=("parallel",),       # v7x: 2 TCs split the batch grid
            vmem_limit_bytes=48 * 1024 * 1024,       # explicit; weights are grid-invariant
        ),
    )(x_tok, pos0, poss, wq2, wkv, wc2, bq2, bkv, bc, mq, mv)

    return out


def reference(x_nchw, params, num_heads):
    """Pure-JAX f32 replica of the PyTorch forward, for correctness checking."""
    N, C, H, W = x_nchw.shape
    HW = H * W
    x = jnp.transpose(x_nchw.reshape(N, C, HW), (2, 0, 1))               # (HW, N, C)
    x = jnp.concatenate([x.mean(axis=0, keepdims=True), x], axis=0)      # (L, N, C)
    x = x + params["pos"][:, None, :]
    L = x.shape[0]
    head_dim = C // num_heads
    q = (x[:1] @ params["wq"].T + params["bq"]) * (head_dim ** -0.5)     # (1, N, C)
    k = x @ params["wk"].T + params["bk"]                                # (L, N, C)
    v = x @ params["wv"].T + params["bv"]
    qh = q.reshape(1, N, num_heads, head_dim)
    kh = k.reshape(L, N, num_heads, head_dim)
    vh = v.reshape(L, N, num_heads, head_dim)
    scores = jnp.einsum("qnhd,knhd->nhqk", qh, kh)
    p = jax.nn.softmax(scores, axis=-1)
    o = jnp.einsum("nhqk,knhd->qnhd", p, vh).reshape(1, N, C)
    y = o @ params["wc"].T + params["bc"]                                # (1, N, Dout)
    return y[0]


if __name__ == "__main__":
    # spacial_dim=8, embed_dim=32, num_heads=4, output_dim=16, batch=2 -> x: (2, 32, 8, 8)
    spacial_dim, embed_dim, num_heads, output_dim, batch = 8, 32, 4, 16, 2

    key = jax.random.PRNGKey(0)
    ks = jax.random.split(key, 12)
    params = {
        "pos": jax.random.normal(ks[0], (spacial_dim ** 2 + 1, embed_dim), jnp.float32)
               / embed_dim ** 0.5,
        "wq": jax.random.normal(ks[1], (embed_dim, embed_dim), jnp.float32) * 0.05,
        "bq": jax.random.normal(ks[2], (embed_dim,), jnp.float32) * 0.05,
        "wk": jax.random.normal(ks[3], (embed_dim, embed_dim), jnp.float32) * 0.05,
        "bk": jax.random.normal(ks[4], (embed_dim,), jnp.float32) * 0.05,
        "wv": jax.random.normal(ks[5], (embed_dim, embed_dim), jnp.float32) * 0.05,
        "bv": jax.random.normal(ks[6], (embed_dim,), jnp.float32) * 0.05,
        "wc": jax.random.normal(ks[7], (output_dim, embed_dim), jnp.float32) * 0.05,
        "bc": jax.random.normal(ks[8], (output_dim,), jnp.float32) * 0.05,
    }
    x = jax.random.normal(ks[11], (batch, embed_dim, spacial_dim, spacial_dim), jnp.float32)

    out = attention_pool2d(x, params, num_heads)
    out = jax.block_until_ready(out)

    ref = reference(x, params, num_heads)
    assert out.shape == (batch, output_dim), out.shape
    max_err = float(jnp.max(jnp.abs(out - ref)))
    # bf16 operands / f32 accumulation vs f32 reference -> loosened tolerance.
    assert jnp.allclose(out, ref, atol=2e-2, rtol=2e-2), max_err

    print("KERNEL_OK")
</pallas_src>

<mosaic_0001>
module attributes {stable_mosaic.version = 11 : i64} {
  func.func @_attn_pool_kernel(%arg0: i32, %arg1: memref<2x64x32xbf16, #tpu.memory_space<vmem>>, %arg2: memref<1x32xf32, #tpu.memory_space<vmem>>, %arg3: memref<64x32xbf16, #tpu.memory_space<vmem>>, %arg4: memref<32x64xbf16, #tpu.memory_space<vmem>>, %arg5: memref<32x64xbf16, #tpu.memory_space<vmem>>, %arg6: memref<64x16xbf16, #tpu.memory_space<vmem>>, %arg7: memref<1x64xf32, #tpu.memory_space<vmem>>, %arg8: memref<1x64xf32, #tpu.memory_space<vmem>>, %arg9: memref<1x16xf32, #tpu.memory_space<vmem>>, %arg10: memref<4x64xbf16, #tpu.memory_space<vmem>>, %arg11: memref<4x64xf32, #tpu.memory_space<vmem>>, %arg12: memref<2x16xf32, #tpu.memory_space<vmem>>) attributes {dimension_semantics = [#tpu.dimension_semantics<parallel>], iteration_bounds = array<i64: 1>, scalar_prefetch = 0 : i64, scratch_operands = 0 : i64, tpu.core_type = #tpu.core_type<tc>, window_params = [{transform_indices = @transform_0, window_bounds = array<i64: 2, 64, 32>}, {pipeline_mode = #tpu.pipeline_mode<synchronous>, transform_indices = @transform_1, window_bounds = array<i64: 1, 32>}, {pipeline_mode = #tpu.pipeline_mode<synchronous>, transform_indices = @transform_2, window_bounds = array<i64: 64, 32>}, {pipeline_mode = #tpu.pipeline_mode<synchronous>, transform_indices = @transform_3, window_bounds = array<i64: 32, 64>}, {pipeline_mode = #tpu.pipeline_mode<synchronous>, transform_indices = @transform_4, window_bounds = array<i64: 32, 64>}, {pipeline_mode = #tpu.pipeline_mode<synchronous>, transform_indices = @transform_5, window_bounds = array<i64: 64, 16>}, {pipeline_mode = #tpu.pipeline_mode<synchronous>, transform_indices = @transform_6, window_bounds = array<i64: 1, 64>}, {pipeline_mode = #tpu.pipeline_mode<synchronous>, transform_indices = @transform_7, window_bounds = array<i64: 1, 64>}, {pipeline_mode = #tpu.pipeline_mode<synchronous>, transform_indices = @transform_8, window_bounds = array<i64: 1, 16>}, {pipeline_mode = #tpu.pipeline_mode<synchronous>, transform_indices = @transform_9, window_bounds = array<i64: 4, 64>}, {pipeline_mode = #tpu.pipeline_mode<synchronous>, transform_indices = @transform_10, window_bounds = array<i64: 4, 64>}, {transform_indices = @transform_11, window_bounds = array<i64: 2, 16>}]} {
    %c0 = arith.constant 0 : index
    %c0_0 = arith.constant 0 : index
    %c0_1 = arith.constant 0 : index
    %0 = vector.load %arg1[%c0, %c0_0, %c0_1] : memref<2x64x32xbf16, #tpu.memory_space<vmem>>, vector<2x64x32xbf16>
    %1 = arith.extf %0 : vector<2x64x32xbf16> to vector<2x64x32xf32>
    %cst = arith.constant dense<0.000000e+00> : vector<2x32xf32>
    %2 = vector.multi_reduction <add>, %1, %cst [1] : vector<2x64x32xf32> to vector<2x32xf32>
    %cst_2 = arith.constant 1.562500e-02 : f32
    %3 = vector.broadcast %cst_2 : f32 to vector<2x32xf32>
    %4 = arith.mulf %2, %3 : vector<2x32xf32>
    %c0_3 = arith.constant 0 : index
    %c0_4 = arith.constant 0 : index
    %5 = vector.load %arg2[%c0_3, %c0_4] : memref<1x32xf32, #tpu.memory_space<vmem>>, vector<1x32xf32>
    %6 = vector.broadcast %5 : vector<1x32xf32> to vector<2x32xf32>
    %7 = arith.addf %4, %6 : vector<2x32xf32>
    %8 = arith.truncf %7 : vector<2x32xf32> to vector<2x32xbf16>
    %c0_5 = arith.constant 0 : index
    %c0_6 = arith.constant 0 : index
    %9 = vector.load %arg3[%c0_5, %c0_6] : memref<64x32xbf16, #tpu.memory_space<vmem>>, vector<64x32xbf16>
    %10 = vector.shape_cast %9 : vector<64x32xbf16> to vector<1x64x32xbf16>
    %11 = vector.broadcast %10 : vector<1x64x32xbf16> to vector<2x64x32xbf16>
    %12 = arith.addf %0, %11 : vector<2x64x32xbf16>
    %13 = vector.shape_cast %12 : vector<2x64x32xbf16> to vector<128x32xbf16>
    %c0_7 = arith.constant 0 : index
    %c0_8 = arith.constant 0 : index
    %14 = vector.load %arg5[%c0_7, %c0_8] : memref<32x64xbf16, #tpu.memory_space<vmem>>, vector<32x64xbf16>
    %cst_9 = arith.constant dense<0.000000e+00> : vector<128x64xf32>
    %15 = tpu.matmul %13, %14, %cst_9 {dimension_numbers = #tpu.dot_dimension_numbers<[1], [0], [0], [1], [0, 0, 1, 1], [], []>} : vector<128x32xbf16>, vector<32x64xbf16>, vector<128x64xf32> -> vector<128x64xf32>
    %c0_10 = arith.constant 0 : index
    %c0_11 = arith.constant 0 : index
    %16 = vector.load %arg8[%c0_10, %c0_11] : memref<1x64xf32, #tpu.memory_space<vmem>>, vector<1x64xf32>
    %17 = vector.broadcast %16 : vector<1x64xf32> to vector<128x64xf32>
    %18 = arith.addf %15, %17 : vector<128x64xf32>
    %19 = arith.truncf %18 : vector<128x64xf32> to vector<128x64xbf16>
    %20 = vector.shape_cast %19 : vector<128x64xbf16> to vector<2x64x64xbf16>
    %c0_12 = arith.constant 0 : index
    %c0_13 = arith.constant 0 : index
    %21 = vector.load %arg5[%c0_12, %c0_13] : memref<32x64xbf16, #tpu.memory_space<vmem>>, vector<32x64xbf16>
    %cst_14 = arith.constant dense<0.000000e+00> : vector<2x64xf32>
    %22 = tpu.matmul %8, %21, %cst_14 {dimension_numbers = #tpu.dot_dimension_numbers<[1], [0], [0], [1], [0, 0, 1, 1], [], []>} : vector<2x32xbf16>, vector<32x64xbf16>, vector<2x64xf32> -> vector<2x64xf32>
    %c0_15 = arith.constant 0 : index
    %c0_16 = arith.constant 0 : index
    %23 = vector.load %arg8[%c0_15, %c0_16] : memref<1x64xf32, #tpu.memory_space<vmem>>, vector<1x64xf32>
    %24 = vector.broadcast %23 : vector<1x64xf32> to vector<2x64xf32>
    %25 = arith.addf %22, %24 : vector<2x64xf32>
    %c0_17 = arith.constant 0 : index
    %c0_18 = arith.constant 0 : index
    %26 = vector.load %arg4[%c0_17, %c0_18] : memref<32x64xbf16, #tpu.memory_space<vmem>>, vector<32x64xbf16>
    %cst_19 = arith.constant dense<0.000000e+00> : vector<2x64xf32>
    %27 = tpu.matmul %8, %26, %cst_19 {dimension_numbers = #tpu.dot_dimension_numbers<[1], [0], [0], [1], [0, 0, 1, 1], [], []>} : vector<2x32xbf16>, vector<32x64xbf16>, vector<2x64xf32> -> vector<2x64xf32>
    %c0_20 = arith.constant 0 : index
    %c0_21 = arith.constant 0 : index
    %28 = vector.load %arg7[%c0_20, %c0_21] : memref<1x64xf32, #tpu.memory_space<vmem>>, vector<1x64xf32>
    %29 = vector.broadcast %28 : vector<1x64xf32> to vector<2x64xf32>
    %30 = arith.addf %27, %29 : vector<2x64xf32>
    %31 = arith.truncf %30 : vector<2x64xf32> to vector<2x64xbf16>
    %32 = vector.shape_cast %31 : vector<2x64xbf16> to vector<2x1x64xbf16>
    %c0_22 = arith.constant 0 : index
    %c0_23 = arith.constant 0 : index
    %33 = vector.load %arg10[%c0_22, %c0_23] : memref<4x64xbf16, #tpu.memory_space<vmem>>, vector<4x64xbf16>
    %34 = vector.shape_cast %33 : vector<4x64xbf16> to vector<1x4x64xbf16>
    %35 = vector.broadcast %32 : vector<2x1x64xbf16> to vector<2x4x64xbf16>
    %36 = vector.broadcast %34 : vector<1x4x64xbf16> to vector<2x4x64xbf16>
    %37 = arith.mulf %35, %36 : vector<2x4x64xbf16>
    "tpu.trace_start"() <{level = 10 : i32, message = "bhc,blc->bhl"}> : () -> ()
    %cst_24 = arith.constant dense<0.000000e+00> : vector<2x4x64xf32>
    %38 = tpu.matmul %37, %20, %cst_24 {dimension_numbers = #tpu.dot_dimension_numbers<[2], [2], [1], [1], [0, 0, 0, 1, 1, 1], [0], [0]>} : vector<2x4x64xbf16>, vector<2x64x64xbf16>, vector<2x4x64xf32> -> vector<2x4x64xf32>
    "tpu.trace_stop"() : () -> ()
    %39 = arith.extf %37 : vector<2x4x64xbf16> to vector<2x4x64xf32>
    %40 = vector.shape_cast %25 : vector<2x64xf32> to vector<2x1x64xf32>
    %41 = vector.broadcast %40 : vector<2x1x64xf32> to vector<2x4x64xf32>
    %42 = arith.mulf %39, %41 : vector<2x4x64xf32>
    %cst_25 = arith.constant dense<0.000000e+00> : vector<2x4xf32>
    %43 = vector.multi_reduction <add>, %42, %cst_25 [2] : vector<2x4x64xf32> to vector<2x4xf32>
    %44 = vector.shape_cast %43 : vector<2x4xf32> to vector<2x4x1xf32>
    %cst_26 = arith.constant dense<0xFF800000> : vector<2x4xf32>
    %45 = vector.multi_reduction <maximumf>, %38, %cst_26 [2] : vector<2x4x64xf32> to vector<2x4xf32>
    %46 = vector.shape_cast %45 : vector<2x4xf32> to vector<2x4x1xf32>
    %47 = arith.maximumf %46, %44 : vector<2x4x1xf32>
    %48 = vector.broadcast %47 : vector<2x4x1xf32> to vector<2x4x64xf32>
    %49 = arith.subf %38, %48 : vector<2x4x64xf32>
    %50 = math.exp %49 : vector<2x4x64xf32>
    %51 = arith.subf %44, %47 : vector<2x4x1xf32>
    %52 = math.exp %51 : vector<2x4x1xf32>
    %cst_27 = arith.constant dense<0.000000e+00> : vector<2x4xf32>
    %53 = vector.multi_reduction <add>, %50, %cst_27 [2] : vector<2x4x64xf32> to vector<2x4xf32>
    %54 = vector.shape_cast %53 : vector<2x4xf32> to vector<2x4x1xf32>
    %55 = arith.addf %52, %54 : vector<2x4x1xf32>
    %56 = tpu.reciprocal %55 {approx = true} : vector<2x4x1xf32> -> vector<2x4x1xf32>
    %57 = arith.truncf %50 : vector<2x4x64xf32> to vector<2x4x64xbf16>
    "tpu.trace_start"() <{level = 10 : i32, message = "bhl,blc->bhc"}> : () -> ()
    %cst_28 = arith.constant dense<0.000000e+00> : vector<2x4x64xf32>
    %58 = tpu.matmul %57, %20, %cst_28 {dimension_numbers = #tpu.dot_dimension_numbers<[2], [1], [1], [2], [0, 0, 0, 1, 1, 2], [0], [0]>} : vector<2x4x64xbf16>, vector<2x64x64xbf16>, vector<2x4x64xf32> -> vector<2x4x64xf32>
    "tpu.trace_stop"() : () -> ()
    %59 = vector.shape_cast %25 : vector<2x64xf32> to vector<2x1x64xf32>
    %60 = vector.broadcast %52 : vector<2x4x1xf32> to vector<2x4x64xf32>
    %61 = vector.broadcast %59 : vector<2x1x64xf32> to vector<2x4x64xf32>
    %62 = arith.mulf %60, %61 : vector<2x4x64xf32>
    %63 = arith.addf %58, %62 : vector<2x4x64xf32>
    %64 = vector.broadcast %56 : vector<2x4x1xf32> to vector<2x4x64xf32>
    %65 = arith.mulf %63, %64 : vector<2x4x64xf32>
    %c0_29 = arith.constant 0 : index
    %c0_30 = arith.constant 0 : index
    %66 = vector.load %arg11[%c0_29, %c0_30] : memref<4x64xf32, #tpu.memory_space<vmem>>, vector<4x64xf32>
    %67 = vector.shape_cast %66 : vector<4x64xf32> to vector<1x4x64xf32>
    %68 = vector.broadcast %67 : vector<1x4x64xf32> to vector<2x4x64xf32>
    %69 = arith.mulf %65, %68 : vector<2x4x64xf32>
    %cst_31 = arith.constant dense<0.000000e+00> : vector<2x64xf32>
    %70 = vector.multi_reduction <add>, %69, %cst_31 [1] : vector<2x4x64xf32> to vector<2x64xf32>
    %71 = arith.truncf %70 : vector<2x64xf32> to vector<2x64xbf16>
    %c0_32 = arith.constant 0 : index
    %c0_33 = arith.constant 0 : index
    %72 = vector.load %arg6[%c0_32, %c0_33] : memref<64x16xbf16, #tpu.memory_space<vmem>>, vector<64x16xbf16>
    %cst_34 = arith.constant dense<0.000000e+00> : vector<2x16xf32>
    %73 = tpu.matmul %71, %72, %cst_34 {dimension_numbers = #tpu.dot_dimension_numbers<[1], [0], [0], [1], [0, 0, 1, 1], [], []>} : vector<2x64xbf16>, vector<64x16xbf16>, vector<2x16xf32> -> vector<2x16xf32>
    %c0_35 = arith.constant 0 : index
    %c0_36 = arith.constant 0 : index
    %74 = vector.load %arg9[%c0_35, %c0_36] : memref<1x16xf32, #tpu.memory_space<vmem>>, vector<1x16xf32>
    %75 = vector.broadcast %74 : vector<1x16xf32> to vector<2x16xf32>
    %76 = arith.addf %73, %75 : vector<2x16xf32>
    %c0_37 = arith.constant 0 : index
    %c0_38 = arith.constant 0 : index
    %77 = vector.load %arg12[%c0_37, %c0_38] : memref<2x16xf32, #tpu.memory_space<vmem>>, vector<2x16xf32>
    tpu.vector_store %arg12[%c0_37, %c0_38], %76 {strides = array<i32>} : memref<2x16xf32, #tpu.memory_space<vmem>>, vector<2x16xf32>,
    return
  }
  func.func @transform_0(%arg0: i32) -> (i32, i32, i32) {
    %c0_i32 = arith.constant 0 : i32
    %c0_i32_0 = arith.constant 0 : i32
    %c0_i32_1 = arith.constant 0 : i32
    return %arg0, %c0_i32, %c0_i32_0 : i32, i32, i32
  }
  func.func @transform_1(%arg0: i32) -> (i32, i32) {
    %c0_i32 = arith.constant 0 : i32
    %c0_i32_0 = arith.constant 0 : i32
    %c0_i32_1 = arith.constant 0 : i32
    return %c0_i32, %c0_i32_0 : i32, i32
  }
  func.func @transform_2(%arg0: i32) -> (i32, i32) {
    %c0_i32 = arith.constant 0 : i32
    %c0_i32_0 = arith.constant 0 : i32
    %c0_i32_1 = arith.constant 0 : i32
    return %c0_i32, %c0_i32_0 : i32, i32
  }
  func.func @transform_3(%arg0: i32) -> (i32, i32) {
    %c0_i32 = arith.constant 0 : i32
    %c0_i32_0 = arith.constant 0 : i32
    %c0_i32_1 = arith.constant 0 : i32
    return %c0_i32, %c0_i32_0 : i32, i32
  }
  func.func @transform_4(%arg0: i32) -> (i32, i32) {
    %c0_i32 = arith.constant 0 : i32
    %c0_i32_0 = arith.constant 0 : i32
    %c0_i32_1 = arith.constant 0 : i32
    return %c0_i32, %c0_i32_0 : i32, i32
  }
  func.func @transform_5(%arg0: i32) -> (i32, i32) {
    %c0_i32 = arith.constant 0 : i32
    %c0_i32_0 = arith.constant 0 : i32
    %c0_i32_1 = arith.constant 0 : i32
    return %c0_i32, %c0_i32_0 : i32, i32
  }
  func.func @transform_6(%arg0: i32) -> (i32, i32) {
    %c0_i32 = arith.constant 0 : i32
    %c0_i32_0 = arith.constant 0 : i32
    %c0_i32_1 = arith.constant 0 : i32
    return %c0_i32, %c0_i32_0 : i32, i32
  }
  func.func @transform_7(%arg0: i32) -> (i32, i32) {
    %c0_i32 = arith.constant 0 : i32
    %c0_i32_0 = arith.constant 0 : i32
    %c0_i32_1 = arith.constant 0 : i32
    return %c0_i32, %c0_i32_0 : i32, i32
  }
  func.func @transform_8(%arg0: i32) -> (i32, i32) {
    %c0_i32 = arith.constant 0 : i32
    %c0_i32_0 = arith.constant 0 : i32
    %c0_i32_1 = arith.constant 0 : i32
    return %c0_i32, %c0_i32_0 : i32, i32
  }
  func.func @transform_9(%arg0: i32) -> (i32, i32) {
    %c0_i32 = arith.constant 0 : i32
    %c0_i32_0 = arith.constant 0 : i32
    %c0_i32_1 = arith.constant 0 : i32
    return %c0_i32, %c0_i32_0 : i32, i32
  }
  func.func @transform_10(%arg0: i32) -> (i32, i32) {
    %c0_i32 = arith.constant 0 : i32
    %c0_i32_0 = arith.constant 0 : i32
    %c0_i32_1 = arith.constant 0 : i32
    return %c0_i32, %c0_i32_0 : i32, i32
  }
  func.func @transform_11(%arg0: i32) -> (i32, i32) {
    %c0_i32 = arith.constant 0 : i32
    %c0_i32_0 = arith.constant 0 : i32
    return %arg0, %c0_i32 : i32, i32
  }
}

</mosaic_0001>

<bundles_post_ra>
// kernel: tpu_custom_call.1
= control target key start
LH: loop header
LB: loop body
LE: loop exit
PB: predicated region body
PF: predicated region fallthrough
CT: control target
= control target key end

     0   :  { %vm72_vm0 = vcmask 261120   ;;  %v1124_v5 = vmov 0.0   ;;  %vm1125_vm1 = vmmov 0   ;;  %s1500_s0 = inlined_call_operand.vmem [shape: bf16[2,64,32], index: 0, kind: input, shape index: {}]   ;;  %s1501_s1 = inlined_call_operand.vmem [shape: f32[1,32], index: 1, kind: input, shape index: {}]   ;;  %s1502_s2 = inlined_call_operand.vmem [shape: bf16[64,32], index: 2, kind: input, shape index: {}]   ;;  %s1503_s3 = inlined_call_operand.vmem [shape: bf16[32,64], index: 3, kind: input, shape index: {}]   ;;  %s1504_s4 = inlined_call_operand.vmem [shape: bf16[32,64], index: 4, kind: input, shape index: {}]   ;;  %s1505_s5 = inlined_call_operand.vmem [shape: bf16[64,16], index: 5, kind: input, shape index: {}]   ;;  %s1506_s6 = inlined_call_operand.vmem [shape: f32[1,64], index: 6, kind: input, shape index: {}]   ;;  %s1507_s7 = inlined_call_operand.vmem [shape: f32[1,64], index: 7, kind: input, shape index: {}]   ;;  %s1508_s8 = inlined_call_operand.vmem [shape: f32[1,16], index: 8, kind: input, shape index: {}]   ;;  %s1509_s9 = inlined_call_operand.vmem [shape: bf16[4,64], index: 9, kind: input, shape index: {}]   ;;  %s1510_s10 = inlined_call_operand.vmem [shape: f32[4,64], index: 10, kind: input, shape index: {}]   ;;  %s1511_s11 = inlined_call_operand.hbm [shape: f32[2,16], index: 11, kind: output, shape index: {}]  }
   0x1   :  { %v1080_v0 = vld [vmem:[%s1504_s4] sm:$0xff]   ;;  %v1081_v1 = vld [vmem:[%s1504_s4 + $0x8] sm:$0xff]   ;;  %1000 = vmatprep.subr.bf16.mxu1 %v1124_v5  ;;  %v44_v26 = vld [vmem:[%s1500_s0 + $0x10] sm:$0xf]  ;;  %1004 = vmatprep.mubr.msk.bf16.mxu1 %vm1125_vm1, %v1124_v5 }
   0x2   :  { %980 = vmatprep.subr.bf16.mxu0 %v1080_v0  ;;  %v40_v2 = vld [vmem:[%s1500_s0] sm:$0xf]  ;;  %v41_v3 = vld [vmem:[%s1500_s0 + $0x4] sm:$0xf]  ;;  %v42_v4 = vld [vmem:[%s1500_s0 + $0x8] sm:$0xf]  ;;  %1001 = vmatpush3.bf16.msra.mxu1 %v1080_v0  ;;  %v60_v36 = vunpack.c.l.bf16 %v44_v26 }
   0x3   :  { %981 = vmatpush3.bf16.msra.mxu0 %v1080_v0  ;;  %v1207_v6 = vld [vmem:[%s1500_s0 + $0x20] sm:$0xf]  ;;  %v1212_v7 = vld [vmem:[%s1500_s0 + $0x24] sm:$0xf]  ;;  %v56_v8 = vunpack.c.l.bf16 %v40_v2  ;;  %v57_v9 = vunpack.c.l.bf16 %v41_v3  ;;  %v58_v10 = vunpack.c.l.bf16 %v42_v4  ;;  %v43_v16 = vld [vmem:[%s1500_s0 + $0xc] sm:$0xf]  ;;  %1002 = vmatprep.subr.bf16.mxu1 %v1124_v5 }
   0x4   :  { %v1217_v11 = vld [vmem:[%s1502_s2] sm:$0xf]  ;;  %982 = vmatprep.subr.bf16.mxu0 %v1081_v1  ;;  %v64_v12 = vunpack.c.l.bf16 %v1207_v6  ;;  %v65_v13 = vunpack.c.l.bf16 %v1212_v7  ;;  %v1224_v14 = vld [vmem:[%s1502_s2 + $0x4] sm:$0xf]  ;;  %v1233_v17 = vld [vmem:[%s1502_s2 + $0x8] sm:$0xf]  ;;  %v59_v29 = vunpack.c.l.bf16 %v43_v16 }
   0x5   :  { %v136_v15 = vadd.bf16 %v1217_v11, %v40_v2  ;;  %v73_v18 = vsel %vm72_vm0, %v56_v8, 0.0  ;;  %v74_v19 = vsel %vm72_vm0, %v57_v9, 0.0  ;;  %v76_v20 = vsel %vm72_vm0, %v58_v10, 0.0  ;;  %v1243_v22 = vld [vmem:[%s1502_s2 + $0xc] sm:$0xf] }
   0x6   :  { %v137_v21 = vadd.bf16 %v1224_v14, %v41_v3  ;;  %v75_v23 = vadd.f32 %v74_v19, %v73_v18  ;;  %v94_v24 = vsel %vm72_vm0, %v64_v12, 0.0  ;;  %v95_v25 = vsel %vm72_vm0, %v65_v13, 0.0  ;;  %v45_v27 = vld [vmem:[%s1500_s0 + $0x14] sm:$0xf]  ;;  %v1257_v31 = vld [vmem:[%s1502_s2 + $0x10] sm:$0xf]  ;;  %1003 = vmatpush3.bf16.msra.mxu1 %v1081_v1 }
   0x7   :  { %983 = vmatpush3.bf16.msra.mxu0 %v1081_v1  ;;  %v138_v30 = vadd.bf16 %v1233_v17, %v42_v4  ;;  %v1262_v32 = vld [vmem:[%s1502_s2 + $0x14] sm:$0xf]  ;;  %v46_v33 = vld [vmem:[%s1500_s0 + $0x18] sm:$0xf]  ;;  %v139_v35 = vadd.bf16 %v1243_v22, %v43_v16  ;;  %v61_v37 = vunpack.c.l.bf16 %v45_v27  ;;  %v47_v38 = vld [vmem:[%s1500_s0 + $0x1c] sm:$0xf]  ;;  %1008 = vmatprep.subr.bf16.mxu1 %v1124_v5  ;;  %v140_v41 = vadd.bf16 %v1257_v31, %v44_v26 }
   0x8   :  { %v905_v28 = vcombine.low %v136_v15, %v137_v21  ;;  %v77_v34 = vadd.f32 %v76_v20, %v75_v23  ;;  %v1274_v39 = vld [vmem:[%s1502_s2 + $0x18] sm:$0xf]  ;;  %1016 = vmatprep.subr.bf16.mxu0 %v1124_v5  ;;  %v78_v40 = vsel %vm72_vm0, %v59_v29, 0.0  ;;  %v141_v42 = vadd.bf16 %v1262_v32, %v45_v27  ;;  %v1285_v44 = vld [vmem:[%s1502_s2 + $0x1c] sm:$0xf] }
   0x9   :  { %v62_v43 = vunpack.c.l.bf16 %v46_v33  ;;  %v50_v45 = vld [vmem:[%s1500_s0 + $0x28] sm:$0xf]  ;;  %v96_v46 = vadd.f32 %v95_v25, %v94_v24  ;;  %v906_v48 = vcombine.low %v138_v30, %v139_v35  ;;  %v80_v49 = vsel %vm72_vm0, %v60_v36, 0.0  ;;  %v51_v50 = vld [vmem:[%s1500_s0 + $0x2c] sm:$0xf] }
   0xa   :  { %984 = vmatprep.mubr.msk.bf16.mxu0 %vm72_vm0, %v905_v28  ;;  %v79_v47 = vadd.f32 %v78_v40, %v77_v34  ;;  %v82_v51 = vsel %vm72_vm0, %v61_v37, 0.0  ;;  %v907_v52 = vcombine.low %v140_v41, %v141_v42  ;;  %v63_v53 = vunpack.c.l.bf16 %v47_v38  ;;  %v52_v55 = vld [vmem:[%s1500_s0 + $0x30] sm:$0xf]  ;;  %v53_v56 = vld [vmem:[%s1500_s0 + $0x34] sm:$0xf] }
   0xb   :  { %v84_v54 = vsel %vm72_vm0, %v62_v43, 0.0  ;;  %985 = vmatmul.mubr.msk.bf16.vlgmr.msra.gmra.mrb[0].mxu0 %vm72_vm0, %v906_v48  ;;  %v142_v58 = vadd.bf16 %v1274_v39, %v46_v33  ;;  %v143_v59 = vadd.bf16 %v1285_v44, %v47_v38  ;;  %v66_v60 = vunpack.c.l.bf16 %v50_v45  ;;  %v54_v61 = vld [vmem:[%s1500_s0 + $0x38] sm:$0xf]  ;;  %v55_v1 = vld [vmem:[%s1500_s0 + $0x3c] sm:$0xf] }
   0xc   :  { %v81_v57 = vadd.f32 %v80_v49, %v79_v47  ;;  %v144_v62 = vadd.bf16 %v1217_v11, %v1207_v6  ;;  %v145_v63 = vadd.bf16 %v1224_v14, %v1212_v7  ;;  %988 = vmatprep.mubr.msk.bf16.mxu0 %vm72_vm0, %v907_v52  ;;  %v67_v0 = vunpack.c.l.bf16 %v51_v50 }
   0xd   :  { %v97_v3 = vsel %vm72_vm0, %v66_v60, 0.0  ;;  %v68_v4 = vunpack.c.l.bf16 %v52_v55  ;;  %v86_v8 = vsel %vm72_vm0, %v63_v53, 0.0  ;;  %v69_v6 = vunpack.c.l.bf16 %v53_v56 }
   0xe   :  { %v83_v2 = vadd.f32 %v82_v51, %v81_v57  ;;  %v98_v9 = vadd.f32 %v97_v3, %v96_v46  ;;  %v99_v10 = vsel %vm72_vm0, %v67_v0, 0.0  ;;  %v908_v12 = vcombine.low %v142_v58, %v143_v59 }
   0xf   :  { %v101_v7 = vsel %vm72_vm0, %v68_v4, 0.0  ;;  %v909_v13 = vcombine.low %v144_v62, %v145_v63  ;;  %v70_v15 = vunpack.c.l.bf16 %v54_v61  ;;  %v103_v18 = vsel %vm72_vm0, %v69_v6, 0.0 }
  0x10   :  { %v85_v11 = vadd.f32 %v84_v54, %v83_v2  ;;  %v100_v14 = vadd.f32 %v99_v10, %v98_v9  ;;  %v71_v19 = vunpack.c.l.bf16 %v55_v1 }
  0x12   :  { %v87_v16 = vadd.f32 %v86_v8, %v85_v11 }
  0x13   :  { %16 = vsyncpa [#allocation3], 0  ;;  %v102_v20 = vadd.f32 %v101_v7, %v100_v14  ;;  %989 = vmatmul.mubr.msk.bf16.gmra.mrb[4].mxu0 %vm72_vm0, %v908_v12  ;;  %v146_v23 = vadd.bf16 %v1233_v17, %v50_v45  ;;  %v147_v24 = vadd.bf16 %v1243_v22, %v51_v50  ;;  %v105_v25 = vsel %vm72_vm0, %v70_v15, 0.0  ;;  %v903_v48 = vld [vmem:[%s1501_s1] ss:$0 sm:$0xff]  ;;  %v1083_v59 = vld [vmem:[%s1503_s3 + $0x8] sm:$0xff]  }
  0x14   :  { %v88_v21 = vrot.slane %v87_v16, 4  ;;  %992 = vmatprep.mubr.msk.bf16.mxu0 %vm72_vm0, %v909_v13  ;;  %v148_v27 = vadd.bf16 %v1257_v31, %v52_v55  ;;  %v149_v28 = vadd.bf16 %v1262_v32, %v53_v56  ;;  %v107_v30 = vsel %vm72_vm0, %v71_v19, 0.0  ;;  %v1082_v57 = vld [vmem:[%s1503_s3] sm:$0xff]   ;;  %s1127_s23 = smov [#allocation2]  }
  0x15   :  { %v104_v26 = vadd.f32 %v103_v18, %v102_v20  ;;  %v910_v35 = vcombine.low %v146_v23, %v147_v24  ;;  %v150_v22 = vadd.bf16 %v1274_v39, %v54_v61  ;;  %v151_v40 = vadd.bf16 %v1285_v44, %v55_v1  ;;  %v1359_v60 = vld [vmem:[%s1507_s7] ss:$0 sm:$0xff]  ;;  %s895_s24 = sshll.u32 %s1127_s23, 4  ;;  %s896_s24 = int_to_ptr.vmem [resolvable:$true] %s895_s24 }
  0x16   :  { %v89_v29 = vadd.f32 %v88_v21, %v87_v16  ;;  %v911_v36 = vcombine.low %v148_v27, %v149_v28  ;;  %vm349_vm2 = vcmask 1041409   ;;  %vm503_vm3 = vcmask 523264   ;;  %s1100_s25 = scalar_lea.vmem %s896_s24, 32  ;;  %p1105_p1 = scmp.lt.s32.totalorder %s896_s24, %s896_s24 }
  0x17   :  { %v106_v33 = vadd.f32 %v105_v25, %v104_v26  ;;  %v912_v43 = vcombine.low %v150_v22, %v151_v40  ;;  %vm651_vm4 = vcmask 519168   ;;  %vm887_vm5 = vcmask 123904   ;;  %p1101_p0 = scmp.ne.s32.totalorder %s896_s24, %s1100_s25  ;;  %p1106_p2 = scmp.lt.s32.totalorder %s1100_s25, %s1100_s25 }
  0x18   :  { %v90_v34 = vrot.slane %v89_v29, 2 }
  0x19   :  { %v108_v37 = vadd.f32 %v107_v30, %v106_v33  ;;  %p1107_p3 = por %p1106_p2, %p1105_p1 }
  0x1a   :  { %v91_v17 = vadd.f32 %v90_v34, %v89_v29 }
  0x1b   :  { %v109_v38 = vrot.slane %v108_v37, 4  ;;  %993 = vmatmul.mubr.msk.bf16.gmra.mrb[8].mxu0 %vm72_vm0, %v910_v35  ;;  %p1108_p4 = pnand %p1107_p3, %p1101_p0 }
  0x1c   :  { %v92_v41 = vrot.slane %v91_v17, 1  ;;  %996 = vmatprep.mubr.msk.bf16.mxu0 %vm72_vm0, %v911_v36 }
  0x1d   :  { %v110_v31 = vadd.f32 %v109_v38, %v108_v37 }
  0x1e   :  { %v93_v32 = vadd.f32 %v92_v41, %v91_v17 }
  0x1f   :  { %v111_v42 = vrot.slane %v110_v31, 2 }
  0x20   :  { %v115_v46 = vmul.f32 0.015625, %v93_v32 }
  0x21   :  { %v112_v45 = vadd.f32 %v111_v42, %v110_v31 }
  0x22   :  { %v124_v39 = vadd.f32 %v903_v48, %v115_v46 }
  0x23   :  { %v113_v47 = vrot.slane %v112_v45, 1  ;;  %997 = vmatmul.mubr.msk.bf16.gmra.mrb[12].mxu0 %vm72_vm0, %v912_v43 }
  0x24   :  { %1024 = vmatprep.mubr.msk.bf16.mxu0 %vm1125_vm1, %v1124_v5  ;;  %v126_v51 = vpack.c.bf16 %v124_v39, %v124_v39  ;;  %v1126_v39 = vmov 1966171168  }
  0x25   :  { %v114_v49 = vadd.f32 %v113_v47, %v112_v45 }
  0x26   :  { %v346_v53 = vunpack.c.l.b16 %v126_v51 }
  0x27   :  { %v116_v44 = vmul.f32 0.015625, %v114_v49 }
  0x29   :  { %v125_v50 = vadd.f32 %v903_v48, %v116_v44  ;;  %v461_v44 = vunpack.c.l.s4 %v1126_v39 }
  0x2b   :  { %v127_v52 = vpack.c.bf16 %v125_v50, %v125_v50  ;;  %v463_v50 = vlaneseq }
  0x2d   :  { %v347_v54 = vunpack.c.l.b16 %v127_v52  ;;  %v924_v52 = vld [vmem:[%s1506_s6] ss:$0 sm:$0xff] }
  0x2f   :  { %v348_v55 = vrot.slane %v347_v54, 7  ;;  %v464_v54 = vshrl.u32 %v463_v50, 7 }
  0x31   :  { %v350_v56 = vsel %vm349_vm2, %v348_v55, %v346_v53  ;;  %v462_v53 = vunpack.c.0.s8 %v461_v44 }
  0x32   :  { %v351_v58 = vpack.c.b16 %v350_v56, %v350_v56 }
  0x34   :  { %1005 = vmatmul.mubr.msk.bf16.vlgmr.msra.gmra.mrb[0].mxu1 %vm72_vm0, %v351_v58 }
  0x35   :  { %1009 = vmatpush3.bf16.msra.mxu1 %v1082_v57  ;;  %1012 = vmatprep.mubr.msk.bf16.mxu1 %vm1125_vm1, %v1124_v5 }
  0x36   :  { %1010 = vmatprep.subr.bf16.mxu1 %v1124_v5 }
  0x39   :  { %1011 = vmatpush3.bf16.msra.mxu1 %v1083_v59 }
  0x3a   :  { %1028 = vmatprep.subr.bf16.mxu1 %v1124_v5 }
  0x3c   :  { %1013 = vmatmul.mubr.msk.bf16.vlgmr.msra.gmra.mrb[4].mxu1 %vm72_vm0, %v351_v58 }
  0x3d   :  { %1036 = vmatprep.mubr.msk.bf16.mxu1 %vm1125_vm1, %v1124_v5 }
  0xde   :  { %v986_v61 = vpop.f32.mrb[0].mxu0 }
  0xdf   :  { %v282_v62 = vadd.f32 %v986_v61, %v1359_v60  ;;  %v273_v63 = vpop.f32.mrb[1].mxu0  ;;  %v465_v61 = vsub.s32 %v462_v53, %v464_v54 }
  0xe0   :  { %v274_v0 = vadd.f32 %v1359_v60, %v273_v63  ;;  %v987_v1 = vpop.f32.mrb[2].mxu0 }
  0xe1   :  { %v285_v2 = vadd.f32 %v987_v1, %v1359_v60  ;;  %v276_v3 = vpop.f32.mrb[3].mxu0 }
  0xe2   :  { %v277_v4 = vadd.f32 %v1359_v60, %v276_v3  ;;  %v481_v3 = vsub.s32 0, %v464_v54  ;;  %v1084_v54 = vld [vmem:[%s1505_s5] sm:$0xff]  }
  0xe3   :  { %v1365_v8 = vpack.c.bf16 %v285_v2, %v282_v62 }
  0xe4   :  { %v1367_v9 = vpack.c.bf16 %v277_v4, %v274_v0 }
  0xe5   :  { %v511_v21 = vsel %vm503_vm3, %v1365_v8, 0 }
  0xe6   :  { %v508_v10 = vsel %vm503_vm3, %v1367_v9, 0  ;;  %v990_v6 = vpop.f32.mrb[4].mxu0 }
  0xe7   :  { %1017 = vmatpush3.bf16.xpose.msra.mxu0 %v508_v10  ;;  %v298_v11 = vadd.f32 %v990_v6, %v1359_v60  ;;  %v289_v12 = vpop.f32.mrb[5].mxu0 }
  0xe8   :  { %v290_v7 = vadd.f32 %v1359_v60, %v289_v12  ;;  %v991_v13 = vpop.f32.mrb[6].mxu0  ;;  %1018 = vmatprep.subr.bf16.mxu0 %v1124_v5 }
  0xe9   :  { %v301_v14 = vadd.f32 %v991_v13, %v1359_v60  ;;  %v292_v15 = vpop.f32.mrb[7].mxu0 }
  0xea   :  { %v293_v16 = vadd.f32 %v1359_v60, %v292_v15  ;;  %v476_v15 = vld [vmem:[%s1509_s9] sm:$0x3] }
  0xeb   :  { %v1376_v18 = vpack.c.bf16 %v301_v14, %v298_v11 }
  0xec   :  { %v1378_v19 = vpack.c.bf16 %v293_v16, %v290_v7 }
  0xed   :  { %v517_v43 = vsel %vm503_vm3, %v1376_v18, 0 }
  0xee   :  { %v994_v20 = vpop.f32.mrb[8].mxu0  ;;  %v514_v34 = vsel %vm503_vm3, %v1378_v19, 0 }
  0xef   :  { %v314_v23 = vadd.f32 %v994_v20, %v1359_v60  ;;  %v305_v24 = vpop.f32.mrb[9].mxu0  ;;  %1019 = vmatpush3.bf16.xpose.msra.mxu0 %v511_v21 }
  0xf0   :  { %v306_v25 = vadd.f32 %v1359_v60, %v305_v24  ;;  %v995_v26 = vpop.f32.mrb[10].mxu0  ;;  %1020 = vmatprep.subr.bf16.mxu0 %v1124_v5 }
  0xf1   :  { %v317_v27 = vadd.f32 %v995_v26, %v1359_v60  ;;  %v308_v28 = vpop.f32.mrb[11].mxu0 }
  0xf2   :  { %v309_v29 = vadd.f32 %v1359_v60, %v308_v28 }
  0xf3   :  { %v1387_v30 = vpack.c.bf16 %v317_v27, %v314_v23 }
  0xf4   :  { %v1389_v33 = vpack.c.bf16 %v309_v29, %v306_v25 }
  0xf5   :  { %v566_v45 = vsel %vm503_vm3, %v1387_v30, 0 }
  0xf6   :  { %v563_v35 = vsel %vm503_vm3, %v1389_v33, 0  ;;  %v998_v36 = vpop.f32.mrb[12].mxu0 }
  0xf7   :  { %1021 = vmatpush3.bf16.xpose.msra.mxu0 %v514_v34  ;;  %1029 = vmatpush3.bf16.xpose.msra.mxu1 %v563_v35  ;;  %v330_v37 = vadd.f32 %v998_v36, %v1359_v60  ;;  %v321_v17 = vpop.f32.mrb[13].mxu0 }
  0xf8   :  { %1022 = vmatprep.subr.bf16.mxu0 %v1124_v5  ;;  %1030 = vmatprep.subr.bf16.mxu1 %v1124_v5  ;;  %v322_v38 = vadd.f32 %v1359_v60, %v321_v17  ;;  %v999_v22 = vpop.f32.mrb[14].mxu0 }
  0xf9   :  { %v333_v40 = vadd.f32 %v999_v22, %v1359_v60  ;;  %v324_v41 = vpop.f32.mrb[15].mxu0 }
  0xfa   :  { %v325_v31 = vadd.f32 %v1359_v60, %v324_v41 }
  0xfb   :  { %v1401_v32 = vpack.c.bf16 %v333_v40, %v330_v37 }
  0xfc   :  { %v1403_v42 = vpack.c.bf16 %v325_v31, %v322_v38 }
  0xfd   :  { %v572_v56 = vsel %vm503_vm3, %v1401_v32, 0 }
  0xfe   :  { %v569_v46 = vsel %vm503_vm3, %v1403_v42, 0 }
  0xff   :  { %1023 = vmatpush3.bf16.xpose.msra.mxu0 %v517_v43  ;;  %1031 = vmatpush3.bf16.xpose.msra.mxu1 %v566_v45 }
 0x100   :  { %1032 = vmatprep.subr.bf16.mxu1 %v1124_v5  ;;  %1040 = vmatprep.subr.bf16.mxu0 %v1124_v5 }
 0x107   :  { %v389_v47 = vpop.f32.mrb[0].mxu1  ;;  %1033 = vmatpush3.bf16.xpose.msra.mxu1 %v569_v46 }
 0x108   :  { %v1006_v48 = vpop.f32.mrb[1].mxu1  ;;  %1034 = vmatprep.subr.bf16.mxu1 %v1124_v5  ;;  %v390_v0 = vadd.f32 %v1359_v60, %v389_v47 }
 0x109   :  { %v392_v49 = vpop.f32.mrb[2].mxu1 }
 0x10a   :  { %v1007_v51 = vpop.f32.mrb[3].mxu1  ;;  %v623_v4 = vrot.slane %v390_v0, %v465_v61 }
 0x10c   :  { %v624_v7 = vcombine.high %v623_v4, %v623_v4  ;;  %v631_v16 = vrot.slane %v623_v4, %v465_v61 }
 0x10e   :  { %v638_v24 = vrot.slane %v624_v7, %v465_v61  ;;  %v1425_v27 = vrot.slane %v631_v16, %v481_v3  ;;  %v780_v7 = vld [vmem:[%s1510_s10] sm:$0xf] }
 0x10f   :  { %v452_v55 = vpop.f32.mrb[4].mxu1  ;;  %1035 = vmatpush3.bf16.xpose.msra.mxu1 %v572_v56  ;;  %v1086_v56 = vld [vmem:[%s1505_s5 + $0x10] sm:$0xff]  }
 0x110   :  { %v453_v57 = vadd.f32 %v924_v52, %v452_v55  ;;  %v1014_v58 = vpop.f32.mrb[5].mxu1  ;;  %1052 = vmatprep.subr.bf16.mxu1 %v1124_v5  ;;  %v1433_v34 = vrot.slane %v638_v24, %v481_v3  ;;  %v1085_v55 = vld [vmem:[%s1505_s5 + $0x8] sm:$0xff]  }
 0x111   :  { %v455_v59 = vpop.f32.mrb[6].mxu1 }
 0x112   :  { %v458_v62 = vpack.c.bf16 %v453_v57, %v453_v57  ;;  %v1015_v63 = vpop.f32.mrb[7].mxu1  ;;  %v1087_v57 = vld [vmem:[%s1505_s5 + $0x18] sm:$0xff]  }
 0x114   :  { %v466_v1 = vrot.slane %v458_v62, %v465_v61 }
 0x116   :  { %v473_v2 = vrot.slane %v466_v1, %v465_v61 }
 0x118   :  { %v475_v10 = vunpack.i.h.s16 %v473_v2  ;;  %v928_v6 = vpack.i.b16 %v473_v2, %v473_v2 }
 0x11a   :  { %v478_v11 = vpack.i.b16 %v475_v10, %v475_v10  ;;  %v482_v12 = vrot.slane %v928_v6, %v481_v3 }
 0x11c   :  { %v486_v13 = vrot.slane %v478_v11, %v481_v3  ;;  %v488_v14 = vpack.i.b16 %v482_v12, %v482_v12 }
 0x11e   :  { %v493_v20 = vrot.slane %v488_v14, %v481_v3  ;;  %v495_v21 = vpack.i.b16 %v486_v13, %v486_v13 }
 0x120   :  { %v500_v23 = vrot.slane %v495_v21, %v481_v3  ;;  %v501_v60 = vmul.bf16 %v493_v20, %v476_v15 }
 0x122   :  { %1025 = vmatmul.mubr.msk.bf16.vlgmr.msra.gmra.mrb[16].mxu0 %vm503_vm3, %v501_v60  ;;  %v502_v25 = vmul.bf16 %v500_v23, %v476_v15  ;;  %v614_v26 = vunpack.c.l.bf16 %v501_v60 }
 0x123   :  { %1041 = vmatpush3.bf16.msra.mxu0 %v1367_v9  ;;  %1048 = vmatprep.mubr.msk.bf16.mxu0 %vm1125_vm1, %v1124_v5 }
 0x124   :  { %1037 = vmatmul.mubr.msk.bf16.vlgmr.msra.gmra.mrb[8].mxu1 %vm503_vm3, %v502_v25  ;;  %1042 = vmatprep.subr.bf16.mxu0 %v1124_v5  ;;  %v649_v28 = vmul.f32 %v1425_v27, %v614_v26  ;;  %v615_v29 = vunpack.c.l.bf16 %v502_v25 }
 0x125   :  { %1053 = vmatpush3.bf16.msra.mxu1 %v1389_v33  ;;  %1060 = vmatprep.mubr.msk.bf16.mxu1 %vm1125_vm1, %v1124_v5 }
 0x126   :  { %v652_v9 = vsel %vm651_vm4, %v649_v28, 0.0  ;;  %1054 = vmatprep.subr.bf16.mxu1 %v1124_v5  ;;  %v650_v35 = vmul.f32 %v1433_v34, %v615_v29 }
 0x127   :  { %1043 = vmatpush3.bf16.msra.mxu0 %v1365_v8  ;;  %653 = vadd.xlane.f32.xlu0 %v652_v9 }
 0x128   :  { %1044 = vmatprep.subr.bf16.mxu0 %v1124_v5  ;;  %v655_v36 = vsel %vm651_vm4, %v650_v35, 0.0 }
 0x129   :  { %1055 = vmatpush3.bf16.msra.mxu1 %v1387_v30 }
 0x12a   :  { %1056 = vmatprep.subr.bf16.mxu1 %v1124_v5 }
 0x12b   :  { %1045 = vmatpush3.bf16.msra.mxu0 %v1378_v19  ;;  %656 = vadd.xlane.f32.xlu0 %v655_v36 }
 0x12c   :  { %1046 = vmatprep.subr.bf16.mxu0 %v1124_v5 }
 0x12d   :  { %1057 = vmatpush3.bf16.msra.mxu1 %v1403_v42 }
 0x12e   :  { %1058 = vmatprep.subr.bf16.mxu1 %v1124_v5 }
 0x12f   :  { %1047 = vmatpush3.bf16.msra.mxu0 %v1376_v18 }
 0x130   :  { %1064 = vmatprep.subr.bf16.mxu0 %v1124_v5 }
 0x131   :  { %1059 = vmatpush3.bf16.msra.mxu1 %v1401_v32 }
 0x1b4   :  { %v654_v31 = vpop.xlane.xlu0 %653 }
 0x1b8   :  { %v657_v45 = vpop.xlane.xlu0 %656 }
 0x1f5   :  { %v553_v8 = vpop.f32.mrb[16].mxu0 }
 0x1f6   :  { %v1026_v30 = vpop.f32.mrb[17].mxu0  ;;  %v658_v33 = vsel %vm651_vm4, %v553_v8, -inf }
 0x1f7   :  { %659 = vmax.xlane.f32.xlu1 %v658_v33  ;;  %v556_v37 = vpop.f32.mrb[18].mxu0  ;;  %v608_v19 = vpop.f32.mrb[8].mxu1 }
 0x1f8   :  { %v1027_v17 = vpop.f32.mrb[19].mxu0  ;;  %v1038_v38 = vpop.f32.mrb[9].mxu1  ;;  %v661_v41 = vsel %vm651_vm4, %v608_v19, -inf }
 0x1f9   :  { %v611_v22 = vpop.f32.mrb[10].mxu1 }
 0x1fa   :  { %v1039_v40 = vpop.f32.mrb[11].mxu1 }
 0x1fb   :  { %662 = vmax.xlane.f32.xlu1 %v661_v41 }
 0x284   :  { %v660_v18 = vpop.xlane.xlu1 %659 }
 0x285   :  { %v664_v42 = vmax.f32 %v660_v18, %v654_v31 }
 0x287   :  { %v666_v43 = vsub.f32 %v553_v8, %v664_v42  ;;  %v672_v58 = vsub.f32 %v654_v31, %v664_v42 }
 0x288   :  { %v663_v32 = vpop.xlane.xlu1 %662 }
 0x289   :  { %v668_v46 = vmul.f32 1.442695, %v666_v43  ;;  %v665_v47 = vmax.f32 %v663_v32, %v657_v45  ;;  %v674_v59 = vmul.f32 1.442695, %v672_v58  ;;  %v933_v32 = vld [vmem:[%s1508_s8] ss:$0 sm:$0xff] }
 0x28b   :  { %1088 = vpow2.f32 %v668_v46  ;;  %v667_v48 = vsub.f32 %v608_v19, %v665_v47  ;;  %v673_v61 = vsub.f32 %v657_v45, %v665_v47 }
 0x28d   :  { %v670_v49 = vmul.f32 1.442695, %v667_v48  ;;  %v676_v62 = vmul.f32 1.442695, %v673_v61 }
 0x28f   :  { %1090 = vpow2.f32 %v670_v49 }
 0x290   :  { %1092 = vpow2.f32 %v674_v59 }
 0x291   :  { %1094 = vpow2.f32 %v676_v62 }
 0x295   :  { %v1089_v39 = vpop.eup %1088 }
 0x296   :  { %v678_v44 = vsel %vm651_vm4, %v1089_v39, 0.0  ;;  %v688_v50 = vpack.c.bf16 %v1089_v39, %v1089_v39 }
 0x297   :  { %679 = vadd.xlane.f32.xlu0 %v678_v44 }
 0x298   :  { %1049 = vmatmul.mubr.msk.bf16.vlgmr.msra.gmra.mrb[20].mxu0 %vm503_vm3, %v688_v50 }
 0x299   :  { %v1091_v51 = vpop.eup %1090  ;;  %1072 = vmatprep.mubr.msk.bf16.mxu0 %vm1125_vm1, %v1124_v5  ;;  %1065 = vmatpush3.bf16.msra.mxu0 %v1084_v54 }
 0x29a   :  { %v681_v52 = vsel %vm651_vm4, %v1091_v51, 0.0  ;;  %v689_v53 = vpack.c.bf16 %v1091_v51, %v1091_v51  ;;  %1066 = vmatprep.subr.bf16.mxu0 %v1124_v5  ;;  %v1093_v0 = vpop.eup %1092 }
 0x29b   :  { %682 = vadd.xlane.f32.xlu1 %v681_v52  ;;  %v1095_v3 = vpop.eup %1094 }
 0x29c   :  { %1061 = vmatmul.mubr.msk.bf16.vlgmr.msra.gmra.mrb[12].mxu1 %vm503_vm3, %v689_v53  ;;  %v691_v16 = vmul.f32 %v1095_v3, %v1433_v34 }
 0x29d   :  { %1067 = vmatpush3.bf16.msra.mxu0 %v1085_v55 }
 0x29e   :  { %1068 = vmatprep.subr.bf16.mxu0 %v1124_v5 }
 0x2a1   :  { %1069 = vmatpush3.bf16.msra.mxu0 %v1086_v56 }
 0x2a2   :  { %1070 = vmatprep.subr.bf16.mxu0 %v1124_v5  ;;  %v690_v5 = vmul.f32 %v1093_v0, %v1425_v27 }
 0x2a5   :  { %1071 = vmatpush3.bf16.msra.mxu0 %v1087_v57 }
 0x324   :  { %v680_v63 = vpop.xlane.xlu0 %679 }
 0x325   :  { %v684_v1 = vadd.f32 %v1093_v0, %v680_v63 }
 0x327   :  { %1096 = vrcp.f32 %v684_v1 }
 0x328   :  { %v683_v2 = vpop.xlane.xlu1 %682 }
 0x329   :  { %v685_v4 = vadd.f32 %v1095_v3, %v683_v2 }
 0x32b   :  { %1098 = vrcp.f32 %v685_v4 }
 0x331   :  { %v1097_v12 = vpop.eup %1096 }
 0x335   :  { %v1099_v24 = vpop.eup %1098 }
 0x36b   :  { %v729_v10 = vpop.f32.mrb[20].mxu0 }
 0x36c   :  { %v730_v6 = vadd.f32 %v729_v10, %v690_v5  ;;  %v1050_v11 = vpop.f32.mrb[21].mxu0 }
 0x36d   :  { %v732_v13 = vpop.f32.mrb[22].mxu0 }
 0x36e   :  { %v778_v14 = vmul.f32 %v1097_v12, %v730_v6  ;;  %v1051_v15 = vpop.f32.mrb[23].mxu0 }
 0x36f   :  { %v772_v20 = vpop.f32.mrb[12].mxu1 }
 0x370   :  { %v781_v21 = vmul.f32 %v780_v7, %v778_v14  ;;  %v773_v23 = vadd.f32 %v772_v20, %v691_v16  ;;  %v1062_v60 = vpop.f32.mrb[13].mxu1 }
 0x371   :  { %v775_v25 = vpop.f32.mrb[14].mxu1 }
 0x372   :  { %v783_v26 = vsel %vm651_vm4, %v781_v21, 0.0  ;;  %v779_v27 = vmul.f32 %v1099_v24, %v773_v23  ;;  %v1063_v28 = vpop.f32.mrb[15].mxu1 }
 0x373   :  { %v784_v29 = vrot.slane %v783_v26, 4 }
 0x374   :  { %v782_v9 = vmul.f32 %v780_v7, %v779_v27 }
 0x375   :  { %v785_v35 = vadd.f32 %v784_v29, %v783_v26 }
 0x376   :  { %v790_v36 = vsel %vm651_vm4, %v782_v9, 0.0 }
 0x377   :  { %v786_v8 = vrot.slane %v785_v35, 2  ;;  %v791_v30 = vrot.slane %v790_v36, 4 }
 0x379   :  { %v787_v33 = vadd.f32 %v786_v8, %v785_v35  ;;  %v792_v37 = vadd.f32 %v791_v30, %v790_v36 }
 0x37b   :  { %v788_v34 = vrot.slane %v787_v33, 1  ;;  %v793_v19 = vrot.slane %v792_v37, 2 }
 0x37d   :  { %v789_v17 = vadd.f32 %v788_v34, %v787_v33  ;;  %v794_v38 = vadd.f32 %v793_v19, %v792_v37 }
 0x37f   :  { %v795_v22 = vrot.slane %v794_v38, 1  ;;  %v797_v40 = vpack.c.bf16 %v789_v17, %v789_v17 }
 0x381   :  { %v796_v41 = vadd.f32 %v795_v22, %v794_v38  ;;  %v816_v18 = vunpack.c.l.b16 %v797_v40 }
 0x383   :  { %v798_v31 = vpack.c.bf16 %v796_v41, %v796_v41 }
 0x385   :  { %v817_v42 = vunpack.c.l.b16 %v798_v31 }
 0x387   :  { %v818_v43 = vsel %vm349_vm2, %v817_v42, %v816_v18 }
 0x388   :  { %v819_v45 = vpack.c.b16 %v818_v43, %v818_v43 }
 0x38a   :  { %1073 = vmatmul.mubr.msk.bf16.vlgmr.msra.gmra.mrb[24].mxu0 %vm503_vm3, %v819_v45 }
 0x45d   :  { %v881_v46 = vpop.f32.mrb[24].mxu0 }
 0x45e   :  { %v882_v47 = vadd.f32 %v933_v32, %v881_v46  ;;  %v1074_v48 = vpop.f32.mrb[25].mxu0 }
 0x45f   :  { %v884_v49 = vpop.f32.mrb[26].mxu0 }
 0x460   :  { %v1075_v39 = vpop.f32.mrb[27].mxu0  ;;  %888 = vst.msk [vmem:[#allocation2] sm:$0x3] %vm887_vm5, %v882_v47 }
 0x461   :  { %1111 = shalt.err (!%p1108_p4)
}
 0x462   :  { %s1112_s8 = scalar_lea.hbm %s1511_s11, 32 }
 0x463   :  { %p1113_p5 = scmp.ne.s32.totalorder %s1511_s11, %s1112_s8  ;;  %p1116_p6 = scmp.lt.u32.totalorder %s1112_s8, %s1511_s11 }
 0x465   :  { %p1118_p7 = pnand %p1116_p6, %p1113_p5 }
 0x467   :  { %1121 = shalt.err (!%p1118_p7)
}
 0x468   :  { %898 = dma.vmem_to_hbm [thread:$0]  %s896_s24, 32, %s1511_s11, [#allocation3]  }
 0x469   :  { %1122 = dma.done.wait [#allocation3], 32  }
 0x46a   :  { %1123 = vsyncadd [#allocation3], 4294967264 }
 0x46b   :  { %902 = vsyncpa [#allocation3], 1 }

</bundles_post_ra>
